<compile_context>
chip_gen: v7x
topology: tpu7x:2x2x1
jax: 0.10.0
libtpu: 0.0.40
codegen_flags: <defaults>
</compile_context>

<pallas_src>
import functools

import numpy as np
import jax
import jax.numpy as jnp
from jax import lax
from jax.experimental import pallas as pl
from jax.experimental.pallas import tpu as pltpu

BN_EPS = 1e-5
LRELU_SLOPE = 0.2
MATMUL_DTYPE = jnp.bfloat16   # conv-matrix / activation operand dtype (MXU)


# ----------------------------- Pallas kernel -------------------------------

def _make_disc_kernel(layer_shapes, batch):
    """layer_shapes: [(Cout, Hout*Wout)] for each conv+BN+LReLU block."""
    nl = len(layer_shapes)

    def kernel(*refs):
        x_ref = refs[0]
        m_refs = refs[1:1 + nl]                  # dense conv matrices (bf16)
        mf_ref = refs[1 + nl]                    # final conv matrix (bf16)
        p_refs = refs[2 + nl:2 + 2 * nl]         # (C*H*W, C) channel pooling
        pt_refs = refs[2 + 2 * nl:2 + 3 * nl]    # (C, C*H*W) channel broadcast
        bn_ref = refs[2 + 3 * nl]                # packed gamma/beta/final bias
        out_ref = refs[3 + 3 * nl]               # packed (B, 128) output slab

        bn = bn_ref[...]                         # (8, 128)
        h = x_ref[...]                           # (B, C*H*W), lane-dense, f32

        for l, (cout, hw) in enumerate(layer_shapes):
            inv_n = 1.0 / float(batch * hw)
            # Conv as one dense bf16 MXU matmul (f32 accumulation).
            y = jnp.dot(h.astype(MATMUL_DTYPE), m_refs[l][...],
                        preferred_element_type=jnp.float32)
            # BatchNorm2d (training-mode batch stats): sum & sum-of-squares
            # pooled to channels with ONE fused 2-row matmul.
            colsum = jnp.sum(y, axis=0, keepdims=True)           # (1, C*H*W)
            colsq = jnp.sum(y * y, axis=0, keepdims=True)        # (1, C*H*W)
            stats = jnp.dot(jnp.concatenate([colsum, colsq], axis=0),
                            p_refs[l][...],
                            preferred_element_type=jnp.float32)  # (2, Cout)
            mean = stats[0:1, :] * inv_n
            ex2 = stats[1:2, :] * inv_n
            var = jnp.maximum(ex2 - mean * mean, 0.0)            # biased var
            gamma = bn[2 * l:2 * l + 1, :cout]
            beta = bn[2 * l + 1:2 * l + 2, :cout]
            scale_c = gamma * lax.rsqrt(var + BN_EPS)            # (1, Cout)
            shift_c = beta - mean * scale_c                      # (1, Cout)
            # Channel -> position broadcast with ONE fused 2-row matmul.
            bro = jnp.dot(jnp.concatenate([scale_c, shift_c], axis=0),
                          pt_refs[l][...],
                          preferred_element_type=jnp.float32)    # (2, C*H*W)
            z = y * bro[0:1, :] + bro[1:2, :]
            h = jnp.where(z >= 0, z, LRELU_SLOPE * z)            # LeakyReLU

        # Final Conv2d (kernel == full spatial extent) + bias + Sigmoid.
        yf = jnp.dot(h.astype(MATMUL_DTYPE), mf_ref[...],
                     preferred_element_type=jnp.float32)         # (B, 1)
        bias = bn[2 * nl:2 * nl + 1, 0:1]
        pred = jax.nn.sigmoid(yf + bias)

        # Lane-dense packed output: [info | pred | zero pad] -> one full store.
        pad_w = out_ref.shape[1] - h.shape[1] - 1
        pieces = [h, pred]
        if pad_w > 0:
            pieces.append(jnp.zeros((batch, pad_w), jnp.float32))
        out_ref[...] = jnp.concatenate(pieces, axis=1)

    return kernel


# ------------------------------- JAX glue ----------------------------------

def _shift_tensor(k, n_in, n_out, stride, pad):
    """Static one-hot tensor T[kk, i, o] = 1 iff i == stride*o + kk - pad."""
    t = np.zeros((k, n_in, n_out), np.float32)
    for kk in range(k):
        for o in range(n_out):
            i = stride * o + kk - pad
            if 0 <= i < n_in:
                t[kk, i, o] = 1.0
    return t


def _conv_dense_matrix(w, hin, win, stride, pad):
    """w: (Cout, Cin, K, K) -> M: (Cin*Hin*Win, Cout*Hout*Wout) such that
    x_flat @ M == Conv2d(x, w, stride, pad) flattened in NCHW order."""
    cout, cin, kh, kw = w.shape
    hout = (hin + 2 * pad - kh) // stride + 1
    wout = (win + 2 * pad - kw) // stride + 1
    th = jnp.asarray(_shift_tensor(kh, hin, hout, stride, pad))
    tw = jnp.asarray(_shift_tensor(kw, win, wout, stride, pad))
    m6 = jnp.einsum('oikl,khx,lwy->ihwoxy', w, th, tw)
    return m6.reshape(cin * hin * win, cout * hout * wout), hout, wout


def prepare_discriminator(params, side):
    """Build the kernel operands.  Call ONCE per weight update and reuse for
    every discriminator forward in the GAN step (hoists the weight-sized
    matrix-construction einsums off the forward hot path)."""
    m_list, p_list, pt_list, shapes = [], [], [], []
    hin = win = side
    for (w, g, b) in params["blocks"]:
        m, hout, wout = _conv_dense_matrix(w, hin, win, stride=2, pad=1)
        cout = w.shape[0]
        m_list.append(m.astype(MATMUL_DTYPE))     # bf16: half DMA + MXU path
        pool = np.kron(np.eye(cout, dtype=np.float32),
                       np.ones((hout * wout, 1), np.float32))
        p_list.append(jnp.asarray(pool))
        pt_list.append(jnp.asarray(pool.T))
        shapes.append((cout, hout, wout))
        hin, win = hout, wout

    c3, h3, w3 = shapes[-1]
    mf = params["final_w"].reshape(1, c3 * h3 * w3).T.astype(MATMUL_DTYPE)

    # Pack gamma/beta (and final bias) into a single (8, 128) VMEM tile.
    rows = []
    for (w, g, b) in params["blocks"]:
        rows.append(jnp.pad(g.astype(jnp.float32), (0, 128 - g.shape[0])))
        rows.append(jnp.pad(b.astype(jnp.float32), (0, 128 - b.shape[0])))
    fb = params["final_b"].astype(jnp.float32)
    rows.append(jnp.pad(fb, (0, 128 - fb.shape[0])))
    while len(rows) % 8 != 0:
        rows.append(jnp.zeros((128,), jnp.float32))
    bn_pack = jnp.stack(rows)

    mats = {"m": tuple(m_list), "mf": mf, "p": tuple(p_list),
            "pt": tuple(pt_list), "bn": bn_pack}
    return mats, tuple(shapes)


@functools.partial(jax.jit, static_argnames=("shapes",))
def discriminator_forward(x, mats, shapes):
    """Returns (seq(x), seq_info(x)) exactly like the PyTorch module."""
    B, C, H, W = x.shape
    x_flat = x.reshape(B, C * H * W)
    nl = len(shapes)
    c3, h3, w3 = shapes[-1]
    info_w = c3 * h3 * w3
    out_w = pl.cdiv(info_w + 1, 128) * 128
    layer_shapes = tuple((c, hh * ww) for c, hh, ww in shapes)

    # Advisory cost estimate for the XLA scheduler around the custom call.
    flops = 0
    kin = C * H * W
    for c, hw in layer_shapes:
        n = c * hw
        flops += 2 * B * kin * n      # conv matmul
        flops += 2 * 2 * n * c        # fused sum/sumsq channel pooling
        flops += 2 * 2 * c * n        # fused scale/shift broadcast
        flops += 6 * B * n            # square, affine, LeakyReLU
        kin = n
    flops += 2 * B * info_w           # final conv
    transcendentals = sum(c for c, _ in layer_shapes) + B   # rsqrt + sigmoid
    bytes_accessed = (x_flat.size * 4
                      + sum(m.size * 2 for m in mats["m"]) + mats["mf"].size * 2
                      + sum(p.size * 4 for p in mats["p"])
                      + sum(p.size * 4 for p in mats["pt"])
                      + mats["bn"].size * 4
                      + B * out_w * 4)

    vmem = pl.BlockSpec(memory_space=pltpu.MemorySpace.VMEM)
    n_inputs = 3 + 3 * nl
    packed = pl.pallas_call(
        _make_disc_kernel(layer_shapes, B),
        out_shape=jax.ShapeDtypeStruct((B, out_w), jnp.float32),
        in_specs=[vmem] * n_inputs,
        out_specs=vmem,
        cost_estimate=pl.CostEstimate(flops=int(flops),
                                      transcendentals=int(transcendentals),
                                      bytes_accessed=int(bytes_accessed)),
    )(x_flat, *mats["m"], mats["mf"], *mats["p"], *mats["pt"], mats["bn"])

    info = packed[:, :info_w].reshape(B, c3, h3, w3)
    pred = packed[:, info_w:info_w + 1].reshape(B, 1, 1, 1)
    return pred, info


# --------------------------- parameter building ----------------------------

def build_params(key, side=16, num_channels=4):
    # mirrors ctabgan's determine_layers_disc(side, num_channels)
    layer_dims = [(1, side), (num_channels, side // 2)]
    while layer_dims[-1][1] > 3 and len(layer_dims) < 4:
        layer_dims.append((layer_dims[-1][0] * 2, layer_dims[-1][1] // 2))
    blocks = []
    for prev, curr in zip(layer_dims, layer_dims[1:]):
        key, k1, k2 = jax.random.split(key, 3)
        w = 0.02 * jax.random.normal(k1, (curr[0], prev[0], 4, 4), jnp.float32)
        g = 1.0 + 0.02 * jax.random.normal(k2, (curr[0],), jnp.float32)
        b = jnp.zeros((curr[0],), jnp.float32)
        blocks.append((w, g, b))
    key, k3, k4 = jax.random.split(key, 3)
    fk = layer_dims[-1][1]
    fw = 0.02 * jax.random.normal(k3, (1, layer_dims[-1][0], fk, fk), jnp.float32)
    fb = 0.02 * jax.random.normal(k4, (1,), jnp.float32)
    return {"blocks": blocks, "final_w": fw, "final_b": fb}


# ---------------------------- pure-JAX reference ----------------------------

def reference_forward(x, params, operand_dtype=jnp.float32):
    """Pure-JAX reference.  operand_dtype=bfloat16 reproduces the kernel's
    mixed-precision operand rounding (all math stays f32)."""
    def rnd(a):
        return a.astype(operand_dtype).astype(jnp.float32)
    h = x
    for (w, g, b) in params["blocks"]:
        y = lax.conv_general_dilated(
            rnd(h), rnd(w), (2, 2), ((1, 1), (1, 1)),
            dimension_numbers=("NCHW", "OIHW", "NCHW"),
            precision=lax.Precision.HIGHEST)
        mean = jnp.mean(y, axis=(0, 2, 3), keepdims=True)
        var = jnp.mean(jnp.square(y - mean), axis=(0, 2, 3), keepdims=True)
        z = (y - mean) * lax.rsqrt(var + BN_EPS)
        z = z * g.reshape(1, -1, 1, 1) + b.reshape(1, -1, 1, 1)
        h = jnp.where(z >= 0, z, LRELU_SLOPE * z)
    info = h
    y = lax.conv_general_dilated(
        rnd(h), rnd(params["final_w"]), (1, 1), ((0, 0), (0, 0)),
        dimension_numbers=("NCHW", "OIHW", "NCHW"),
        precision=lax.Precision.HIGHEST)
    pred = jax.nn.sigmoid(y + params["final_b"].reshape(1, -1, 1, 1))
    return pred, info


# ---------------------------------- main ------------------------------------

if __name__ == "__main__":
    key = jax.random.PRNGKey(0)
    key, xkey = jax.random.split(key)
    # Discriminator input: single-channel "image" of size side x side (NCHW).
    x = jax.random.normal(xkey, (2, 1, 16, 16), jnp.float32)
    params = build_params(key, side=16, num_channels=4)

    # Built once per weight update; reused across forwards of the GAN step.
    mats, shapes = prepare_discriminator(params, side=16)

    pred, info = discriminator_forward(x, mats, shapes)
    pred = jax.block_until_ready(pred)
    info = jax.block_until_ready(info)

    assert pred.shape == (2, 1, 1, 1)
    assert info.shape == (2, 16, 2, 2)

    # (1) Kernel exactness vs a reference with the SAME bf16 operand rounding
    #     (f32 math): verifies the fused kernel math itself (tight).
    q_pred, q_info = reference_forward(x, params, jnp.bfloat16)
    assert jnp.allclose(pred, q_pred, rtol=1e-3, atol=1e-3)
    assert jnp.allclose(info, q_info, rtol=1e-3, atol=1e-3)

    # (2) Mixed-precision drift vs the pure-f32 module forward stays small
    #     (bf16 conv-weight rounding, amplified by small-batch BN statistics
    #     at the last layer, bounds the feature-map tolerance).
    ref_pred, ref_info = reference_forward(x, params)
    assert jnp.allclose(pred, ref_pred, rtol=1e-2, atol=1e-2)
    assert jnp.allclose(info, ref_info, rtol=1e-1, atol=1e-1)

    print("KERNEL_OK")
</pallas_src>

<mosaic_0001>
module attributes {stable_mosaic.version = 11 : i64} {
  func.func @kernel(%arg0: memref<2x256xf32, #tpu.memory_space<vmem>>, %arg1: memref<256x256xbf16, #tpu.memory_space<vmem>>, %arg2: memref<256x128xbf16, #tpu.memory_space<vmem>>, %arg3: memref<128x64xbf16, #tpu.memory_space<vmem>>, %arg4: memref<64x1xbf16, #tpu.memory_space<vmem>>, %arg5: memref<256x4xf32, #tpu.memory_space<vmem>>, %arg6: memref<128x8xf32, #tpu.memory_space<vmem>>, %arg7: memref<64x16xf32, #tpu.memory_space<vmem>>, %arg8: memref<4x256xf32, #tpu.memory_space<vmem>>, %arg9: memref<8x128xf32, #tpu.memory_space<vmem>>, %arg10: memref<16x64xf32, #tpu.memory_space<vmem>>, %arg11: memref<8x128xf32, #tpu.memory_space<vmem>>, %arg12: memref<2x128xf32, #tpu.memory_space<vmem>>) attributes {dimension_semantics = [], scalar_prefetch = 0 : i64, scratch_operands = 0 : i64, tpu.core_type = #tpu.core_type<tc>} {
    %c0 = arith.constant 0 : index
    %c0_0 = arith.constant 0 : index
    %0 = vector.load %arg11[%c0, %c0_0] : memref<8x128xf32, #tpu.memory_space<vmem>>, vector<8x128xf32>
    %c0_1 = arith.constant 0 : index
    %c0_2 = arith.constant 0 : index
    %1 = vector.load %arg0[%c0_1, %c0_2] : memref<2x256xf32, #tpu.memory_space<vmem>>, vector<2x256xf32>
    %2 = arith.truncf %1 : vector<2x256xf32> to vector<2x256xbf16>
    %c0_3 = arith.constant 0 : index
    %c0_4 = arith.constant 0 : index
    %3 = vector.load %arg1[%c0_3, %c0_4] : memref<256x256xbf16, #tpu.memory_space<vmem>>, vector<256x256xbf16>
    %cst = arith.constant dense<0.000000e+00> : vector<2x256xf32>
    %4 = tpu.matmul %2, %3, %cst {dimension_numbers = #tpu.dot_dimension_numbers<[1], [0], [0], [1], [0, 0, 1, 1], [], []>} : vector<2x256xbf16>, vector<256x256xbf16>, vector<2x256xf32> -> vector<2x256xf32>
    %cst_5 = arith.constant dense<0.000000e+00> : vector<256xf32>
    %5 = vector.multi_reduction <add>, %4, %cst_5 [0] : vector<2x256xf32> to vector<256xf32>
    %6 = vector.shape_cast %5 : vector<256xf32> to vector<1x256xf32>
    %7 = arith.mulf %4, %4 : vector<2x256xf32>
    %cst_6 = arith.constant dense<0.000000e+00> : vector<256xf32>
    %8 = vector.multi_reduction <add>, %7, %cst_6 [0] : vector<2x256xf32> to vector<256xf32>
    %9 = vector.shape_cast %8 : vector<256xf32> to vector<1x256xf32>
    %10 = tpu.concatenate %6, %9 in 0 : vector<1x256xf32>, vector<1x256xf32> -> vector<2x256xf32>
    %c0_7 = arith.constant 0 : index
    %c0_8 = arith.constant 0 : index
    %11 = vector.load %arg5[%c0_7, %c0_8] : memref<256x4xf32, #tpu.memory_space<vmem>>, vector<256x4xf32>
    %cst_9 = arith.constant dense<0.000000e+00> : vector<2x4xf32>
    %12 = tpu.matmul %10, %11, %cst_9 {dimension_numbers = #tpu.dot_dimension_numbers<[1], [0], [0], [1], [0, 0, 1, 1], [], []>} : vector<2x256xf32>, vector<256x4xf32>, vector<2x4xf32> -> vector<2x4xf32>
    %13 = vector.extract_strided_slice %12 {offsets = [0, 0], sizes = [1, 4], strides = [1, 1]} : vector<2x4xf32> to vector<1x4xf32>
    %cst_10 = arith.constant 7.812500e-03 : f32
    %14 = vector.broadcast %cst_10 : f32 to vector<1x4xf32>
    %15 = arith.mulf %13, %14 : vector<1x4xf32>
    %16 = vector.extract_strided_slice %12 {offsets = [1, 0], sizes = [1, 4], strides = [1, 1]} : vector<2x4xf32> to vector<1x4xf32>
    %cst_11 = arith.constant 7.812500e-03 : f32
    %17 = vector.broadcast %cst_11 : f32 to vector<1x4xf32>
    %18 = arith.mulf %16, %17 : vector<1x4xf32>
    %19 = arith.mulf %15, %15 : vector<1x4xf32>
    %20 = arith.subf %18, %19 : vector<1x4xf32>
    %cst_12 = arith.constant 0.000000e+00 : f32
    %21 = vector.broadcast %cst_12 : f32 to vector<1x4xf32>
    %22 = arith.maximumf %20, %21 : vector<1x4xf32>
    %23 = vector.extract_strided_slice %0 {offsets = [0, 0], sizes = [1, 4], strides = [1, 1]} : vector<8x128xf32> to vector<1x4xf32>
    %24 = vector.extract_strided_slice %0 {offsets = [1, 0], sizes = [1, 4], strides = [1, 1]} : vector<8x128xf32> to vector<1x4xf32>
    %cst_13 = arith.constant 9.99999974E-6 : f32
    %25 = vector.broadcast %cst_13 : f32 to vector<1x4xf32>
    %26 = arith.addf %22, %25 : vector<1x4xf32>
    %27 = math.rsqrt %26 : vector<1x4xf32>
    %28 = arith.mulf %23, %27 : vector<1x4xf32>
    %29 = arith.mulf %15, %28 : vector<1x4xf32>
    %30 = arith.subf %24, %29 : vector<1x4xf32>
    %31 = tpu.concatenate %28, %30 in 0 : vector<1x4xf32>, vector<1x4xf32> -> vector<2x4xf32>
    %c0_14 = arith.constant 0 : index
    %c0_15 = arith.constant 0 : index
    %32 = vector.load %arg8[%c0_14, %c0_15] : memref<4x256xf32, #tpu.memory_space<vmem>>, vector<4x256xf32>
    %cst_16 = arith.constant dense<0.000000e+00> : vector<2x256xf32>
    %33 = tpu.matmul %31, %32, %cst_16 {dimension_numbers = #tpu.dot_dimension_numbers<[1], [0], [0], [1], [0, 0, 1, 1], [], []>} : vector<2x4xf32>, vector<4x256xf32>, vector<2x256xf32> -> vector<2x256xf32>
    %34 = vector.extract_strided_slice %33 {offsets = [0, 0], sizes = [1, 256], strides = [1, 1]} : vector<2x256xf32> to vector<1x256xf32>
    %35 = vector.broadcast %34 : vector<1x256xf32> to vector<2x256xf32>
    %36 = arith.mulf %4, %35 : vector<2x256xf32>
    %37 = vector.extract_strided_slice %33 {offsets = [1, 0], sizes = [1, 256], strides = [1, 1]} : vector<2x256xf32> to vector<1x256xf32>
    %38 = vector.broadcast %37 : vector<1x256xf32> to vector<2x256xf32>
    %39 = arith.addf %36, %38 : vector<2x256xf32>
    %cst_17 = arith.constant 0.000000e+00 : f32
    %40 = vector.broadcast %cst_17 : f32 to vector<2x256xf32>
    %41 = arith.cmpf oge, %39, %40 : vector<2x256xf32>
    %cst_18 = arith.constant 2.000000e-01 : f32
    %42 = vector.broadcast %cst_18 : f32 to vector<2x256xf32>
    %43 = arith.mulf %42, %39 : vector<2x256xf32>
    %44 = arith.select %41, %39, %43 : vector<2x256xi1>, vector<2x256xf32>
    %45 = arith.truncf %44 : vector<2x256xf32> to vector<2x256xbf16>
    %c0_19 = arith.constant 0 : index
    %c0_20 = arith.constant 0 : index
    %46 = vector.load %arg2[%c0_19, %c0_20] : memref<256x128xbf16, #tpu.memory_space<vmem>>, vector<256x128xbf16>
    %cst_21 = arith.constant dense<0.000000e+00> : vector<2x128xf32>
    %47 = tpu.matmul %45, %46, %cst_21 {dimension_numbers = #tpu.dot_dimension_numbers<[1], [0], [0], [1], [0, 0, 1, 1], [], []>} : vector<2x256xbf16>, vector<256x128xbf16>, vector<2x128xf32> -> vector<2x128xf32>
    %cst_22 = arith.constant dense<0.000000e+00> : vector<128xf32>
    %48 = vector.multi_reduction <add>, %47, %cst_22 [0] : vector<2x128xf32> to vector<128xf32>
    %49 = vector.shape_cast %48 : vector<128xf32> to vector<1x128xf32>
    %50 = arith.mulf %47, %47 : vector<2x128xf32>
    %cst_23 = arith.constant dense<0.000000e+00> : vector<128xf32>
    %51 = vector.multi_reduction <add>, %50, %cst_23 [0] : vector<2x128xf32> to vector<128xf32>
    %52 = vector.shape_cast %51 : vector<128xf32> to vector<1x128xf32>
    %53 = tpu.concatenate %49, %52 in 0 : vector<1x128xf32>, vector<1x128xf32> -> vector<2x128xf32>
    %c0_24 = arith.constant 0 : index
    %c0_25 = arith.constant 0 : index
    %54 = vector.load %arg6[%c0_24, %c0_25] : memref<128x8xf32, #tpu.memory_space<vmem>>, vector<128x8xf32>
    %cst_26 = arith.constant dense<0.000000e+00> : vector<2x8xf32>
    %55 = tpu.matmul %53, %54, %cst_26 {dimension_numbers = #tpu.dot_dimension_numbers<[1], [0], [0], [1], [0, 0, 1, 1], [], []>} : vector<2x128xf32>, vector<128x8xf32>, vector<2x8xf32> -> vector<2x8xf32>
    %56 = vector.extract_strided_slice %55 {offsets = [0, 0], sizes = [1, 8], strides = [1, 1]} : vector<2x8xf32> to vector<1x8xf32>
    %cst_27 = arith.constant 3.125000e-02 : f32
    %57 = vector.broadcast %cst_27 : f32 to vector<1x8xf32>
    %58 = arith.mulf %56, %57 : vector<1x8xf32>
    %59 = vector.extract_strided_slice %55 {offsets = [1, 0], sizes = [1, 8], strides = [1, 1]} : vector<2x8xf32> to vector<1x8xf32>
    %cst_28 = arith.constant 3.125000e-02 : f32
    %60 = vector.broadcast %cst_28 : f32 to vector<1x8xf32>
    %61 = arith.mulf %59, %60 : vector<1x8xf32>
    %62 = arith.mulf %58, %58 : vector<1x8xf32>
    %63 = arith.subf %61, %62 : vector<1x8xf32>
    %cst_29 = arith.constant 0.000000e+00 : f32
    %64 = vector.broadcast %cst_29 : f32 to vector<1x8xf32>
    %65 = arith.maximumf %63, %64 : vector<1x8xf32>
    %66 = vector.extract_strided_slice %0 {offsets = [2, 0], sizes = [1, 8], strides = [1, 1]} : vector<8x128xf32> to vector<1x8xf32>
    %67 = vector.extract_strided_slice %0 {offsets = [3, 0], sizes = [1, 8], strides = [1, 1]} : vector<8x128xf32> to vector<1x8xf32>
    %cst_30 = arith.constant 9.99999974E-6 : f32
    %68 = vector.broadcast %cst_30 : f32 to vector<1x8xf32>
    %69 = arith.addf %65, %68 : vector<1x8xf32>
    %70 = math.rsqrt %69 : vector<1x8xf32>
    %71 = arith.mulf %66, %70 : vector<1x8xf32>
    %72 = arith.mulf %58, %71 : vector<1x8xf32>
    %73 = arith.subf %67, %72 : vector<1x8xf32>
    %74 = tpu.concatenate %71, %73 in 0 : vector<1x8xf32>, vector<1x8xf32> -> vector<2x8xf32>
    %c0_31 = arith.constant 0 : index
    %c0_32 = arith.constant 0 : index
    %75 = vector.load %arg9[%c0_31, %c0_32] : memref<8x128xf32, #tpu.memory_space<vmem>>, vector<8x128xf32>
    %cst_33 = arith.constant dense<0.000000e+00> : vector<2x128xf32>
    %76 = tpu.matmul %74, %75, %cst_33 {dimension_numbers = #tpu.dot_dimension_numbers<[1], [0], [0], [1], [0, 0, 1, 1], [], []>} : vector<2x8xf32>, vector<8x128xf32>, vector<2x128xf32> -> vector<2x128xf32>
    %77 = vector.extract_strided_slice %76 {offsets = [0, 0], sizes = [1, 128], strides = [1, 1]} : vector<2x128xf32> to vector<1x128xf32>
    %78 = vector.broadcast %77 : vector<1x128xf32> to vector<2x128xf32>
    %79 = arith.mulf %47, %78 : vector<2x128xf32>
    %80 = vector.extract_strided_slice %76 {offsets = [1, 0], sizes = [1, 128], strides = [1, 1]} : vector<2x128xf32> to vector<1x128xf32>
    %81 = vector.broadcast %80 : vector<1x128xf32> to vector<2x128xf32>
    %82 = arith.addf %79, %81 : vector<2x128xf32>
    %cst_34 = arith.constant 0.000000e+00 : f32
    %83 = vector.broadcast %cst_34 : f32 to vector<2x128xf32>
    %84 = arith.cmpf oge, %82, %83 : vector<2x128xf32>
    %cst_35 = arith.constant 2.000000e-01 : f32
    %85 = vector.broadcast %cst_35 : f32 to vector<2x128xf32>
    %86 = arith.mulf %85, %82 : vector<2x128xf32>
    %87 = arith.select %84, %82, %86 : vector<2x128xi1>, vector<2x128xf32>
    %88 = arith.truncf %87 : vector<2x128xf32> to vector<2x128xbf16>
    %c0_36 = arith.constant 0 : index
    %c0_37 = arith.constant 0 : index
    %89 = vector.load %arg3[%c0_36, %c0_37] : memref<128x64xbf16, #tpu.memory_space<vmem>>, vector<128x64xbf16>
    %cst_38 = arith.constant dense<0.000000e+00> : vector<2x64xf32>
    %90 = tpu.matmul %88, %89, %cst_38 {dimension_numbers = #tpu.dot_dimension_numbers<[1], [0], [0], [1], [0, 0, 1, 1], [], []>} : vector<2x128xbf16>, vector<128x64xbf16>, vector<2x64xf32> -> vector<2x64xf32>
    %cst_39 = arith.constant dense<0.000000e+00> : vector<64xf32>
    %91 = vector.multi_reduction <add>, %90, %cst_39 [0] : vector<2x64xf32> to vector<64xf32>
    %92 = vector.shape_cast %91 : vector<64xf32> to vector<1x64xf32>
    %93 = arith.mulf %90, %90 : vector<2x64xf32>
    %cst_40 = arith.constant dense<0.000000e+00> : vector<64xf32>
    %94 = vector.multi_reduction <add>, %93, %cst_40 [0] : vector<2x64xf32> to vector<64xf32>
    %95 = vector.shape_cast %94 : vector<64xf32> to vector<1x64xf32>
    %96 = tpu.concatenate %92, %95 in 0 : vector<1x64xf32>, vector<1x64xf32> -> vector<2x64xf32>
    %c0_41 = arith.constant 0 : index
    %c0_42 = arith.constant 0 : index
    %97 = vector.load %arg7[%c0_41, %c0_42] : memref<64x16xf32, #tpu.memory_space<vmem>>, vector<64x16xf32>
    %cst_43 = arith.constant dense<0.000000e+00> : vector<2x16xf32>
    %98 = tpu.matmul %96, %97, %cst_43 {dimension_numbers = #tpu.dot_dimension_numbers<[1], [0], [0], [1], [0, 0, 1, 1], [], []>} : vector<2x64xf32>, vector<64x16xf32>, vector<2x16xf32> -> vector<2x16xf32>
    %99 = vector.extract_strided_slice %98 {offsets = [0, 0], sizes = [1, 16], strides = [1, 1]} : vector<2x16xf32> to vector<1x16xf32>
    %cst_44 = arith.constant 1.250000e-01 : f32
    %100 = vector.broadcast %cst_44 : f32 to vector<1x16xf32>
    %101 = arith.mulf %99, %100 : vector<1x16xf32>
    %102 = vector.extract_strided_slice %98 {offsets = [1, 0], sizes = [1, 16], strides = [1, 1]} : vector<2x16xf32> to vector<1x16xf32>
    %cst_45 = arith.constant 1.250000e-01 : f32
    %103 = vector.broadcast %cst_45 : f32 to vector<1x16xf32>
    %104 = arith.mulf %102, %103 : vector<1x16xf32>
    %105 = arith.mulf %101, %101 : vector<1x16xf32>
    %106 = arith.subf %104, %105 : vector<1x16xf32>
    %cst_46 = arith.constant 0.000000e+00 : f32
    %107 = vector.broadcast %cst_46 : f32 to vector<1x16xf32>
    %108 = arith.maximumf %106, %107 : vector<1x16xf32>
    %109 = vector.extract_strided_slice %0 {offsets = [4, 0], sizes = [1, 16], strides = [1, 1]} : vector<8x128xf32> to vector<1x16xf32>
    %110 = vector.extract_strided_slice %0 {offsets = [5, 0], sizes = [1, 16], strides = [1, 1]} : vector<8x128xf32> to vector<1x16xf32>
    %cst_47 = arith.constant 9.99999974E-6 : f32
    %111 = vector.broadcast %cst_47 : f32 to vector<1x16xf32>
    %112 = arith.addf %108, %111 : vector<1x16xf32>
    %113 = math.rsqrt %112 : vector<1x16xf32>
    %114 = arith.mulf %109, %113 : vector<1x16xf32>
    %115 = arith.mulf %101, %114 : vector<1x16xf32>
    %116 = arith.subf %110, %115 : vector<1x16xf32>
    %117 = tpu.concatenate %114, %116 in 0 : vector<1x16xf32>, vector<1x16xf32> -> vector<2x16xf32>
    %c0_48 = arith.constant 0 : index
    %c0_49 = arith.constant 0 : index
    %118 = vector.load %arg10[%c0_48, %c0_49] : memref<16x64xf32, #tpu.memory_space<vmem>>, vector<16x64xf32>
    %cst_50 = arith.constant dense<0.000000e+00> : vector<2x64xf32>
    %119 = tpu.matmul %117, %118, %cst_50 {dimension_numbers = #tpu.dot_dimension_numbers<[1], [0], [0], [1], [0, 0, 1, 1], [], []>} : vector<2x16xf32>, vector<16x64xf32>, vector<2x64xf32> -> vector<2x64xf32>
    %120 = vector.extract_strided_slice %119 {offsets = [0, 0], sizes = [1, 64], strides = [1, 1]} : vector<2x64xf32> to vector<1x64xf32>
    %121 = vector.broadcast %120 : vector<1x64xf32> to vector<2x64xf32>
    %122 = arith.mulf %90, %121 : vector<2x64xf32>
    %123 = vector.extract_strided_slice %119 {offsets = [1, 0], sizes = [1, 64], strides = [1, 1]} : vector<2x64xf32> to vector<1x64xf32>
    %124 = vector.broadcast %123 : vector<1x64xf32> to vector<2x64xf32>
    %125 = arith.addf %122, %124 : vector<2x64xf32>
    %cst_51 = arith.constant 0.000000e+00 : f32
    %126 = vector.broadcast %cst_51 : f32 to vector<2x64xf32>
    %127 = arith.cmpf oge, %125, %126 : vector<2x64xf32>
    %cst_52 = arith.constant 2.000000e-01 : f32
    %128 = vector.broadcast %cst_52 : f32 to vector<2x64xf32>
    %129 = arith.mulf %128, %125 : vector<2x64xf32>
    %130 = arith.select %127, %125, %129 : vector<2x64xi1>, vector<2x64xf32>
    %131 = arith.truncf %130 : vector<2x64xf32> to vector<2x64xbf16>
    %c0_53 = arith.constant 0 : index
    %c0_54 = arith.constant 0 : index
    %132 = vector.load %arg4[%c0_53, %c0_54] : memref<64x1xbf16, #tpu.memory_space<vmem>>, vector<64x1xbf16>
    %cst_55 = arith.constant dense<0.000000e+00> : vector<2x1xf32>
    %133 = tpu.matmul %131, %132, %cst_55 {dimension_numbers = #tpu.dot_dimension_numbers<[1], [0], [0], [1], [0, 0, 1, 1], [], []>} : vector<2x64xbf16>, vector<64x1xbf16>, vector<2x1xf32> -> vector<2x1xf32>
    %134 = vector.extract_strided_slice %0 {offsets = [6, 0], sizes = [1, 1], strides = [1, 1]} : vector<8x128xf32> to vector<1x1xf32>
    %135 = vector.broadcast %134 : vector<1x1xf32> to vector<2x1xf32>
    %136 = arith.addf %133, %135 : vector<2x1xf32>
    %137 = arith.negf %136 : vector<2x1xf32>
    %138 = math.exp %137 : vector<2x1xf32>
    %cst_56 = arith.constant 1.000000e+00 : f32
    %139 = vector.broadcast %cst_56 : f32 to vector<2x1xf32>
    %140 = arith.addf %139, %138 : vector<2x1xf32>
    %141 = arith.divf %139, %140 : vector<2x1xf32>
    %cst_57 = arith.constant 0.000000e+00 : f32
    %142 = vector.broadcast %cst_57 : f32 to vector<2x63xf32>
    %143 = tpu.concatenate %130, %141, %142 in 1 : vector<2x64xf32>, vector<2x1xf32>, vector<2x63xf32> -> vector<2x128xf32>
    %c0_58 = arith.constant 0 : index
    %c0_59 = arith.constant 0 : index
    %144 = vector.load %arg12[%c0_58, %c0_59] : memref<2x128xf32, #tpu.memory_space<vmem>>, vector<2x128xf32>
    tpu.vector_store %arg12[%c0_58, %c0_59], %143 {strides = array<i32>} : memref<2x128xf32, #tpu.memory_space<vmem>>, vector<2x128xf32>,
    return
  }
}

</mosaic_0001>

<bundles_post_ra>
// kernel: discriminator_forward.1
= control target key start
LH: loop header
LB: loop body
LE: loop exit
PB: predicated region body
PF: predicated region fallthrough
CT: control target
= control target key end

     0   :  { %vm290_vm0 = vcmask 1041408   ;;  %vm321_vm1 = vcmask 1040384   ;;  %vm452_vm2 = vcmask 1043456   ;;  %vm448_vm3 = vcmask 31744   ;;  %s2335_s1 = inlined_call_operand.vmem [shape: bf16[256,256], index: 1, kind: input, shape index: {}]   ;;  %s2336_s0 = inlined_call_operand.vmem [shape: f32[2,256], index: 0, kind: input, shape index: {}]   ;;  %s2337_s5 = inlined_call_operand.vmem [shape: f32[256,4], index: 5, kind: input, shape index: {}]   ;;  %s2338_s8 = inlined_call_operand.vmem [shape: f32[4,256], index: 8, kind: input, shape index: {}]   ;;  %s2339_s2 = inlined_call_operand.vmem [shape: bf16[256,128], index: 2, kind: input, shape index: {}]   ;;  %s2340_s11 = inlined_call_operand.vmem [shape: f32[8,128], index: 11, kind: input, shape index: {}]   ;;  %s2341_s6 = inlined_call_operand.vmem [shape: f32[128,8], index: 6, kind: input, shape index: {}]   ;;  %s2342_s9 = inlined_call_operand.vmem [shape: f32[8,128], index: 9, kind: input, shape index: {}]   ;;  %s2343_s3 = inlined_call_operand.vmem [shape: bf16[128,64], index: 3, kind: input, shape index: {}]   ;;  %s2344_s7 = inlined_call_operand.vmem [shape: f32[64,16], index: 7, kind: input, shape index: {}]   ;;  %s2345_s10 = inlined_call_operand.vmem [shape: f32[16,64], index: 10, kind: input, shape index: {}]   ;;  %s2346_s4 = inlined_call_operand.vmem [shape: bf16[64,1], index: 4, kind: input, shape index: {}]   ;;  %s2347_s12 = inlined_call_operand.vmem [shape: f32[2,128], index: 12, kind: output, shape index: {}]  }
   0x1   :  { %v1699_v0 = vld [vmem:[%s2335_s1 + $0x4] ss:$8 sps:$4 sm:$0xff]   ;;  %v1701_v1 = vld [vmem:[%s2335_s1] ss:$8 sps:$4 sm:$0xff]   ;;  %v1702_v2 = vld [vmem:[%s2335_s1 + $0x14] ss:$8 sps:$4 sm:$0xff]  }
   0x2   :  { %249 = vmatprep.subr.bf16.mxu0 %v1699_v0  ;;  %v1704_v3 = vld [vmem:[%s2335_s1 + $0x10] ss:$8 sps:$4 sm:$0xff]   ;;  %v1705_v4 = vld [vmem:[%s2335_s1 + $0x24] ss:$8 sps:$4 sm:$0xff]   ;;  %v1707_v5 = vld [vmem:[%s2335_s1 + $0x20] ss:$8 sps:$4 sm:$0xff]  }
   0x3   :  { %250 = vmatpush1.bf16.msra.mxu0 %v1701_v1  ;;  %v1708_v6 = vld [vmem:[%s2335_s1 + $0x34] ss:$8 sps:$4 sm:$0xff]   ;;  %v1710_v7 = vld [vmem:[%s2335_s1 + $0x30] ss:$8 sps:$4 sm:$0xff]   ;;  %v1711_v8 = vld [vmem:[%s2335_s1 + $0x44] ss:$8 sps:$4 sm:$0xff]  }
   0x4   :  { %251 = vmatprep.subr.bf16.mxu0 %v1702_v2  ;;  %v1713_v9 = vld [vmem:[%s2335_s1 + $0x40] ss:$8 sps:$4 sm:$0xff]   ;;  %v1714_v10 = vld [vmem:[%s2335_s1 + $0x54] ss:$8 sps:$4 sm:$0xff]   ;;  %v1716_v11 = vld [vmem:[%s2335_s1 + $0x50] ss:$8 sps:$4 sm:$0xff]  }
   0x5   :  { %v1717_v12 = vld [vmem:[%s2335_s1 + $0x64] ss:$8 sps:$4 sm:$0xff]   ;;  %v1719_v13 = vld [vmem:[%s2335_s1 + $0x60] ss:$8 sps:$4 sm:$0xff]   ;;  %v1720_v15 = vld [vmem:[%s2335_s1 + $0x74] ss:$8 sps:$4 sm:$0xff]  }
   0x6   :  { %v1900_v14 = vld.sshfl [vmem:[%s2336_s0] sm:$0x33 pattern:$0x76325410]  ;;  %v341_v18 = vld [vmem:[%s2337_s5 + $0x88] sm:$0xff]  ;;  %v342_v22 = vld [vmem:[%s2337_s5 + $0x90] sm:$0xff] }
   0x7   :  { %252 = vmatpush1.bf16.msra.mxu0 %v1704_v3  ;;  %v52_v16 = vcombine.high %v1900_v14, %v1900_v14  ;;  %v340_v17 = vld [vmem:[%s2337_s5 + $0x80] sm:$0xff]  ;;  %v325_v21 = vld [vmem:[%s2337_s5 + $0x8] sm:$0xff]  ;;  %v343_v23 = vld [vmem:[%s2337_s5 + $0x98] sm:$0xff]  ;;  %v55_v56 = vpack.c.bf16 %v1900_v14, %v1900_v14  ;;  %vm1788_vm6 = vmmov 0   ;;  %vm852_vm7 = vcmask 64512  }
   0x8   :  { %253 = vmatprep.subr.bf16.mxu0 %v1705_v4  ;;  %v324_v19 = vld [vmem:[%s2337_s5] sm:$0xff]  ;;  %v1624_v20 = vpack.c.bf16 %v341_v18, %v340_v17  ;;  %v1628_v26 = vpack.c.bf16 %v343_v23, %v342_v22  ;;  %v326_v27 = vld [vmem:[%s2337_s5 + $0x10] sm:$0xff]  ;;  %v327_v28 = vld [vmem:[%s2337_s5 + $0x18] sm:$0xff]  ;;  %vm1044_vm9 = vcmask 517120   ;;  %vm1069_vm10 = vcmask 523264  }
   0x9   :  { %v56_v24 = vpack.c.bf16 %v52_v16, %v52_v16  ;;  %v1626_v25 = vpack.c.bf16 %v325_v21, %v324_v19  ;;  %v344_v29 = vld [vmem:[%s2337_s5 + $0xa0] sm:$0xff]  ;;  %v345_v30 = vld [vmem:[%s2337_s5 + $0xa8] sm:$0xff]  ;;  %v1630_v31 = vpack.c.bf16 %v327_v28, %v326_v27  ;;  %v1722_v32 = vld [vmem:[%s2335_s1 + $0x70] ss:$8 sps:$4 sm:$0xff]   ;;  %vm1170_vm11 = vcmask 130048  }
   0xa   :  { %1625 = vmatprep.subr.bf16.mxu1 %v1624_v20  ;;  %v1632_v33 = vpack.c.bf16 %v345_v30, %v344_v29  ;;  %v328_v34 = vld [vmem:[%s2337_s5 + $0x20] sm:$0xff]  ;;  %v329_v35 = vld [vmem:[%s2337_s5 + $0x28] sm:$0xff]  ;;  %v346_v37 = vld [vmem:[%s2337_s5 + $0xb0] sm:$0xff]  ;;  %vm1348_vm13 = vcmask 531456  }
   0xb   :  { %254 = vmatpush1.bf16.msra.mxu0 %v1707_v5  ;;  %281 = vmatprep.mubr.bf16.mxu0 %v56_v24  ;;  %v1723_v36 = vld [vmem:[%s2335_s1 + $0x84] ss:$8 sps:$4 sm:$0xff]   ;;  %v347_v38 = vld [vmem:[%s2337_s5 + $0xb8] sm:$0xff]  ;;  %v1634_v39 = vpack.c.bf16 %v329_v35, %v328_v34  ;;  %v1725_v40 = vld [vmem:[%s2335_s1 + $0x80] ss:$8 sps:$4 sm:$0xff]  }
   0xc   :  { %255 = vmatprep.subr.bf16.mxu0 %v1708_v6  ;;  %1627 = vmatpush3.bf16.msra.mxu1 %v1626_v25  ;;  %v1636_v41 = vpack.c.bf16 %v347_v38, %v346_v37  ;;  %v1726_v42 = vld [vmem:[%s2335_s1 + $0x94] ss:$8 sps:$4 sm:$0xff]   ;;  %v1728_v43 = vld [vmem:[%s2335_s1 + $0x90] ss:$8 sps:$4 sm:$0xff]   ;;  %v1729_v44 = vld [vmem:[%s2335_s1 + $0xa4] ss:$8 sps:$4 sm:$0xff]  }
   0xd   :  { %1629 = vmatprep.subr.bf16.mxu1 %v1628_v26  ;;  %v1731_v45 = vld [vmem:[%s2335_s1 + $0xa0] ss:$8 sps:$4 sm:$0xff]   ;;  %v1732_v46 = vld [vmem:[%s2335_s1 + $0xb4] ss:$8 sps:$4 sm:$0xff]   ;;  %v1734_v47 = vld [vmem:[%s2335_s1 + $0xb0] ss:$8 sps:$4 sm:$0xff]  }
   0xe   :  { %v1735_v48 = vld [vmem:[%s2335_s1 + $0xc4] ss:$8 sps:$4 sm:$0xff]   ;;  %v1737_v49 = vld [vmem:[%s2335_s1 + $0xc0] ss:$8 sps:$4 sm:$0xff]   ;;  %v1738_v50 = vld [vmem:[%s2335_s1 + $0xd4] ss:$8 sps:$4 sm:$0xff]  }
   0xf   :  { %256 = vmatpush1.bf16.msra.mxu0 %v1710_v7  ;;  %v1740_v51 = vld [vmem:[%s2335_s1 + $0xd0] ss:$8 sps:$4 sm:$0xff]   ;;  %v1741_v52 = vld [vmem:[%s2335_s1 + $0xe4] ss:$8 sps:$4 sm:$0xff]   ;;  %v1743_v53 = vld [vmem:[%s2335_s1 + $0xe0] ss:$8 sps:$4 sm:$0xff]  }
  0x10   :  { %257 = vmatprep.subr.bf16.mxu0 %v1711_v8  ;;  %1631 = vmatpush3.bf16.msra.mxu1 %v1630_v31  ;;  %v1744_v54 = vld [vmem:[%s2335_s1 + $0xf4] ss:$8 sps:$4 sm:$0xff]   ;;  %v1746_v55 = vld [vmem:[%s2335_s1 + $0xf0] ss:$8 sps:$4 sm:$0xff]   ;;  %v348_v60 = vld [vmem:[%s2337_s5 + $0xc0] sm:$0xff] }
  0x11   :  { %1633 = vmatprep.subr.bf16.mxu1 %v1632_v33  ;;  %v330_v57 = vld [vmem:[%s2337_s5 + $0x30] sm:$0xff]  ;;  %v331_v58 = vld [vmem:[%s2337_s5 + $0x38] sm:$0xff]  ;;  %v349_v61 = vld [vmem:[%s2337_s5 + $0xc8] sm:$0xff] }
  0x12   :  { %v1638_v59 = vpack.c.bf16 %v331_v58, %v330_v57  ;;  %v1640_v62 = vpack.c.bf16 %v349_v61, %v348_v60  ;;  %v332_v63 = vld [vmem:[%s2337_s5 + $0x40] sm:$0xff]  ;;  %v333_v0 = vld [vmem:[%s2337_s5 + $0x48] sm:$0xff]  ;;  %v350_v2 = vld [vmem:[%s2337_s5 + $0xd0] sm:$0xff]  ;;  %v1786_v58 = vmov 0.0  }
  0x13   :  { %258 = vmatpush1.bf16.msra.mxu0 %v1713_v9  ;;  %v1642_v1 = vpack.c.bf16 %v333_v0, %v332_v63  ;;  %v351_v3 = vld [vmem:[%s2337_s5 + $0xd8] sm:$0xff]  ;;  %v334_v5 = vld [vmem:[%s2337_s5 + $0x50] sm:$0xff]  ;;  %v352_v8 = vld [vmem:[%s2337_s5 + $0xe0] sm:$0xff] }
  0x14   :  { %259 = vmatprep.subr.bf16.mxu0 %v1714_v10  ;;  %1635 = vmatpush3.bf16.msra.mxu1 %v1634_v39  ;;  %v1644_v4 = vpack.c.bf16 %v351_v3, %v350_v2  ;;  %v335_v6 = vld [vmem:[%s2337_s5 + $0x58] sm:$0xff]  ;;  %v353_v9 = vld [vmem:[%s2337_s5 + $0xe8] sm:$0xff]  ;;  %v336_v10 = vld [vmem:[%s2337_s5 + $0x60] sm:$0xff] }
  0x15   :  { %1637 = vmatprep.subr.bf16.mxu1 %v1636_v41  ;;  %v1646_v7 = vpack.c.bf16 %v335_v6, %v334_v5  ;;  %v355_v14 = vld [vmem:[%s2337_s5 + $0xf8] sm:$0xff]  ;;  %v338_v17 = vld [vmem:[%s2337_s5 + $0x70] sm:$0xff]  ;;  %v2082_v6 = vld [vmem:[%s2340_s11] sm:$0xff] }
  0x16   :  { %v339_v18 = vld [vmem:[%s2337_s5 + $0x78] sm:$0xff] }
  0x17   :  { %260 = vmatpush1.bf16.msra.mxu0 %v1716_v11  ;;  %v1648_v11 = vpack.c.bf16 %v353_v9, %v352_v8  ;;  %v1654_v19 = vpack.c.bf16 %v339_v18, %v338_v17  ;;  %v1753_v17 = vld [vmem:[%s2339_s2 + $0x10] sm:$0xff]   ;;  %v1754_v18 = vld [vmem:[%s2339_s2 + $0x58] sm:$0xff]  }
  0x18   :  { %261 = vmatprep.subr.bf16.mxu0 %v1717_v12  ;;  %1639 = vmatpush3.bf16.msra.mxu1 %v1638_v59  ;;  %v337_v12 = vld [vmem:[%s2337_s5 + $0x68] sm:$0xff]  ;;  %v1748_v59 = vld [vmem:[%s2339_s2 + $0x40] sm:$0xff]  }
  0x19   :  { %1641 = vmatprep.subr.bf16.mxu1 %v1640_v62 }
  0x1b   :  { %262 = vmatpush1.bf16.msra.mxu0 %v1719_v13  ;;  %v354_v13 = vld [vmem:[%s2337_s5 + $0xf0] sm:$0xff] }
  0x1c   :  { %263 = vmatprep.subr.bf16.mxu0 %v1720_v15  ;;  %1643 = vmatpush3.bf16.msra.mxu1 %v1642_v1  ;;  %v1650_v15 = vpack.c.bf16 %v337_v12, %v336_v10  ;;  %v1652_v16 = vpack.c.bf16 %v355_v14, %v354_v13  ;;  %v1749_v12 = vld [vmem:[%s2339_s2] sm:$0xff]   ;;  %v1750_v13 = vld [vmem:[%s2339_s2 + $0x48] sm:$0xff]  }
  0x1d   :  { %1645 = vmatprep.subr.bf16.mxu1 %v1644_v4 }
  0x1f   :  { %264 = vmatpush1.bf16.msra.mxu0 %v1722_v32 }
  0x20   :  { %265 = vmatprep.subr.bf16.mxu0 %v1723_v36  ;;  %1647 = vmatpush3.bf16.msra.mxu1 %v1646_v7 }
  0x21   :  { %1649 = vmatprep.subr.bf16.mxu1 %v1648_v11 }
  0x23   :  { %266 = vmatpush1.bf16.msra.mxu0 %v1725_v40 }
  0x24   :  { %267 = vmatprep.subr.bf16.mxu0 %v1726_v42  ;;  %1651 = vmatpush3.bf16.msra.mxu1 %v1650_v15  ;;  %v1751_v15 = vld [vmem:[%s2339_s2 + $0x8] sm:$0xff]  }
  0x25   :  { %1653 = vmatprep.subr.bf16.mxu1 %v1652_v16  ;;  %v1752_v16 = vld [vmem:[%s2339_s2 + $0x50] sm:$0xff]  }
  0x27   :  { %268 = vmatpush1.bf16.msra.mxu0 %v1728_v43 }
  0x28   :  { %269 = vmatprep.subr.bf16.mxu0 %v1729_v44  ;;  %1655 = vmatpush3.bf16.msra.mxu1 %v1654_v19  ;;  %v1755_v19 = vld [vmem:[%s2339_s2 + $0x18] sm:$0xff]  }
  0x2b   :  { %270 = vmatpush1.bf16.msra.mxu0 %v1731_v45 }
  0x2c   :  { %271 = vmatprep.subr.bf16.mxu0 %v1732_v46 }
  0x2f   :  { %272 = vmatpush1.bf16.msra.mxu0 %v1734_v47 }
  0x30   :  { %273 = vmatprep.subr.bf16.mxu0 %v1735_v48 }
  0x33   :  { %274 = vmatpush1.bf16.msra.mxu0 %v1737_v49 }
  0x34   :  { %275 = vmatprep.subr.bf16.mxu0 %v1738_v50 }
  0x37   :  { %276 = vmatpush1.bf16.msra.mxu0 %v1740_v51 }
  0x38   :  { %277 = vmatprep.subr.bf16.mxu0 %v1741_v52 }
  0x3b   :  { %278 = vmatpush1.bf16.msra.mxu0 %v1743_v53 }
  0x3c   :  { %279 = vmatprep.subr.bf16.mxu0 %v1744_v54 }
  0x3f   :  { %280 = vmatpush1.bf16.msra.mxu0 %v1746_v55 }
  0x42   :  { %282 = vmatmul.mubr.bf16.vlgmr.msra.gmra.mrb[0].mxu0 %v55_v56  ;;  %v445_v56 = vld [vmem:[%s2338_s8] sm:$0xff] }
  0x43   :  { %v447_v57 = vcombine.high %v445_v56, %v445_v56  ;;  %1558 = vmatprep.mubr.msk.f32.mxu0 %vm1788_vm6, %v1786_v58 }
  0x45   :  { %1388 = vmatprep.subr.msk.mxu1 %vm452_vm2, %v447_v57 }
 0x115   :  { %v2056_v20 = vpop.f32.mrb[0].mxu0 }
 0x116   :  { %v291_v21 = vsel %vm290_vm0, %v2056_v20, 0.0  ;;  %v305_v22 = vmul.f32 %v2056_v20, %v2056_v20  ;;  %v2062_v23 = vpop.f32.mrb[1].mxu0 }
 0x117   :  { %v292_v24 = vrot.slane %v291_v21, 4  ;;  %v298_v25 = vsel %vm290_vm0, %v2062_v23, 0.0  ;;  %v306_v26 = vmul.f32 %v2062_v23, %v2062_v23  ;;  %v287_v27 = vpop.f32.mrb[2].mxu0 }
 0x118   :  { %v307_v28 = vsel %vm290_vm0, %v305_v22, 0.0  ;;  %v299_v29 = vrot.slane %v298_v25, 4  ;;  %v288_v30 = vpop.f32.mrb[3].mxu0  ;;  %v1757_v22 = vld [vmem:[%s2339_s2 + $0x20] sm:$0xff]   ;;  %v1761_v27 = vld [vmem:[%s2339_s2 + $0x30] sm:$0xff]  }
 0x119   :  { %v293_v31 = vadd.f32 %v292_v24, %v291_v21  ;;  %v308_v32 = vrot.slane %v307_v28, 4  ;;  %v314_v33 = vsel %vm290_vm0, %v306_v26, 0.0  ;;  %v1756_v21 = vld [vmem:[%s2339_s2 + $0x60] sm:$0xff]   ;;  %v1758_v24 = vld [vmem:[%s2339_s2 + $0x68] sm:$0xff]   ;;  %v1760_v26 = vld [vmem:[%s2339_s2 + $0x70] sm:$0xff]   ;;  %v1787_v30 = vmov 0.0|0.0  }
 0x11a   :  { %v300_v34 = vadd.f32 %v299_v29, %v298_v25  ;;  %v315_v35 = vrot.slane %v314_v33, 4  ;;  %v1759_v25 = vld [vmem:[%s2339_s2 + $0x28] sm:$0xff]   ;;  %v1763_v29 = vld [vmem:[%s2339_s2 + $0x38] sm:$0xff]   ;;  %1656 = vmatprep.subr.bf16.mxu0 %v1787_v30 }
 0x11b   :  { %v294_v36 = vrot.slane %v293_v31, 2  ;;  %v309_v37 = vadd.f32 %v308_v32, %v307_v28  ;;  %v1762_v28 = vld [vmem:[%s2339_s2 + $0x78] sm:$0xff]   ;;  %v741_v32 = vld [vmem:[%s2341_s6 + $0x8] sm:$0xff] }
 0x11c   :  { %v301_v38 = vrot.slane %v300_v34, 2  ;;  %v316_v39 = vadd.f32 %v315_v35, %v314_v33  ;;  %v742_v33 = vld [vmem:[%s2341_s6 + $0x10] sm:$0xff]  ;;  %v743_v35 = vld [vmem:[%s2341_s6 + $0x18] sm:$0xff] }
 0x11d   :  { %v295_v40 = vadd.f32 %v294_v36, %v293_v31  ;;  %v310_v41 = vrot.slane %v309_v37, 2  ;;  %v740_v31 = vld [vmem:[%s2341_s6] sm:$0xff]  ;;  %v1660_v36 = vpack.c.bf16 %v743_v35, %v742_v33 }
 0x11e   :  { %v302_v42 = vadd.f32 %v301_v38, %v300_v34  ;;  %v317_v43 = vrot.slane %v316_v39, 2  ;;  %v1657_v34 = vpack.c.bf16 %v741_v32, %v740_v31  ;;  %v745_v38 = vld [vmem:[%s2341_s6 + $0x28] sm:$0xff]  ;;  %v851_v35 = vld [vmem:[%s2342_s9] sm:$0xff] }
 0x11f   :  { %v311_v44 = vadd.f32 %v310_v41, %v309_v37  ;;  %v296_v47 = vrot.slane %v295_v40, 1  ;;  %v744_v37 = vld [vmem:[%s2341_s6 + $0x20] sm:$0xff] }
 0x120   :  { %v303_v45 = vrot.slane %v302_v42, 1  ;;  %v318_v46 = vadd.f32 %v317_v43, %v316_v39  ;;  %1658 = vmatpush3.bf16.msra.mxu0 %v1657_v34  ;;  %v1663_v39 = vpack.c.bf16 %v745_v38, %v744_v37  ;;  %v1765_v37 = vld [vmem:[%s2343_s3 + $0x8] sm:$0xff]   ;;  %v1766_v38 = vld [vmem:[%s2343_s3 + $0x10] sm:$0xff]  }
 0x121   :  { %v312_v48 = vrot.slane %v311_v44, 1  ;;  %v297_v53 = vadd.f32 %v296_v47, %v295_v40  ;;  %1659 = vmatprep.subr.bf16.mxu0 %v1787_v30  ;;  %v528_v40 = vlaneseq }
 0x122   :  { %v319_v49 = vrot.slane %v318_v46, 1  ;;  %v304_v51 = vadd.f32 %v303_v45, %v302_v42 }
 0x123   :  { %v313_v50 = vadd.f32 %v312_v48, %v311_v44  ;;  %v2155_v41 = vshrl.u32 %v528_v40, 7  ;;  %v1768_v40 = vld [vmem:[%s2343_s3 + $0x20] sm:$0xff]  }
 0x124   :  { %v320_v52 = vadd.f32 %v319_v49, %v318_v46  ;;  %1661 = vmatpush3.bf16.msra.mxu0 %v1660_v36  ;;  %v1764_v36 = vld [vmem:[%s2343_s3] sm:$0xff]  }
 0x125   :  { %v322_v55 = vsel %vm321_vm1, %v297_v53, %v313_v50  ;;  %1662 = vmatprep.subr.bf16.mxu0 %v1787_v30  ;;  %v2158_v42 = vsub.s32 0, %v2155_v41  ;;  %v2161_v43 = vsub.s32 1, %v2155_v41 }
 0x126   :  { %v323_v54 = vsel %vm321_vm1, %v304_v51, %v320_v52 }
 0x127   :  { %420 = vmatprep.mubr.f32.mxu1 %v323_v54 }
 0x128   :  { %421 = vmatmul.mubr.f32.vlgmr.msra.gmra.mrb[0].mxu1 %v322_v55  ;;  %1664 = vmatpush3.bf16.msra.mxu0 %v1663_v39  ;;  %v1767_v39 = vld [vmem:[%s2343_s3 + $0x18] sm:$0xff]  }
 0x129   :  { %521 = vmatprep.mubr.f32.mxu1 %v1786_v58  ;;  %1389 = vmatpush1.msk.msra.mxu1 %vm452_vm2, %v445_v56 }
 0x12a   :  { %1459 = vmatprep.subr.bf16.mxu1 %v1748_v59  ;;  %1665 = vmatprep.subr.bf16.mxu0 %v1787_v30 }
 0x1fb   :  { %v1456_v60 = vpop.f32.mrb[0].mxu1 }
 0x1fc   :  { %v1457_v61 = vpop.f32.mrb[1].mxu1 }
 0x1fd   :  { %v1458_v62 = vadd.f32 %v1457_v61, %v1456_v60 }
 0x1ff   :  { %v426_v63 = vmul.f32 0.0078125, %v1458_v62  ;;  %v748_v62 = vld [vmem:[%s2341_s6 + $0x40] sm:$0xff] }
 0x201   :  { %v427_v0 = vmul.f32 %v426_v63, %v426_v63 }
 0x203   :  { %v429_v1 = vrot.slane %v427_v0, 7 }
 0x205   :  { %v431_v2 = vsub.f32 %v426_v63, %v429_v1  ;;  %v750_v1 = vld [vmem:[%s2341_s6 + $0x50] sm:$0xff] }
 0x207   :  { %v432_v3 = vmax.f32 %v431_v2, 0.0  ;;  %v751_v2 = vld [vmem:[%s2341_s6 + $0x58] sm:$0xff] }
 0x209   :  { %v433_v4 = vadd.f32 1e-05, %v432_v3  ;;  %v1672_v3 = vpack.c.bf16 %v751_v2, %v750_v1 }
 0x20b   :  { %1776 = vrsqrt.f32 %v433_v4  ;;  %v752_v4 = vld [vmem:[%s2341_s6 + $0x60] sm:$0xff] }
 0x215   :  { %v1777_v5 = vpop.eup %1776 }
 0x216   :  { %v436_v7 = vrot.slane %v1777_v5, 1  ;;  %v753_v5 = vld [vmem:[%s2341_s6 + $0x68] sm:$0xff] }
 0x218   :  { %v438_v8 = vmul.f32 %v436_v7, %v2082_v6  ;;  %v1675_v7 = vpack.c.bf16 %v753_v5, %v752_v4 }
 0x21a   :  { %v439_v9 = vmul.f32 %v438_v8, %v426_v63  ;;  %v749_v63 = vld [vmem:[%s2341_s6 + $0x48] sm:$0xff] }
 0x21b   :  { %v1669_v0 = vpack.c.bf16 %v749_v63, %v748_v62  ;;  %v1771_v62 = vld [vmem:[%s2343_s3 + $0x38] sm:$0xff]  }
 0x21c   :  { %v441_v10 = vrot.slane %v439_v9, 7  ;;  %v755_v9 = vld [vmem:[%s2341_s6 + $0x78] sm:$0xff] }
 0x21e   :  { %v443_v11 = vsub.f32 %v2082_v6, %v441_v10 }
 0x220   :  { %v444_v14 = vsel %vm321_vm1, %v438_v8, %v443_v11  ;;  %v754_v8 = vld [vmem:[%s2341_s6 + $0x70] sm:$0xff] }
 0x221   :  { %1390 = vmatmul.mubr.msk.f32.vlgmr.msra.gmra.mrb[2].mxu1 %vm448_vm3, %v444_v14  ;;  %v1678_v10 = vpack.c.bf16 %v755_v9, %v754_v8  ;;  %v1061_v9 = vld [vmem:[%s2344_s7] sm:$0xff] }
 0x222   :  { %1460 = vmatpush3.bf16.msra.mxu1 %v1749_v12 }
 0x223   :  { %1461 = vmatprep.subr.bf16.mxu1 %v1750_v13 }
 0x226   :  { %1462 = vmatpush3.bf16.msra.mxu1 %v1751_v15 }
 0x227   :  { %1463 = vmatprep.subr.bf16.mxu1 %v1752_v16 }
 0x22a   :  { %1464 = vmatpush3.bf16.msra.mxu1 %v1753_v17 }
 0x22b   :  { %1465 = vmatprep.subr.bf16.mxu1 %v1754_v18 }
 0x22e   :  { %1466 = vmatpush3.bf16.msra.mxu1 %v1755_v19 }
 0x22f   :  { %1467 = vmatprep.subr.bf16.mxu1 %v1756_v21 }
 0x232   :  { %1468 = vmatpush3.bf16.msra.mxu1 %v1757_v22 }
 0x233   :  { %1469 = vmatprep.subr.bf16.mxu1 %v1758_v24 }
 0x236   :  { %1470 = vmatpush3.bf16.msra.mxu1 %v1759_v25 }
 0x237   :  { %1471 = vmatprep.subr.bf16.mxu1 %v1760_v26 }
 0x23a   :  { %1472 = vmatpush3.bf16.msra.mxu1 %v1761_v27 }
 0x23b   :  { %1473 = vmatprep.subr.bf16.mxu1 %v1762_v28 }
 0x23e   :  { %1474 = vmatpush3.bf16.msra.mxu1 %v1763_v29 }
 0x23f   :  { %1566 = vmatprep.subr.bf16.mxu1 %v1786_v58 }
 0x2f4   :  { %v523_v44 = vpop.f32.mrb[2].mxu1 }
 0x2f5   :  { %v531_v45 = vrot.slane %v523_v44, %v2158_v42  ;;  %v525_v46 = vpop.f32.mrb[3].mxu1  ;;  %v541_v49 = vrot.slane %v523_v44, %v2161_v43 }
 0x2f6   :  { %v535_v47 = vrot.slane %v525_v46, %v2158_v42  ;;  %v545_v51 = vrot.slane %v525_v46, %v2161_v43 }
 0x2f7   :  { %v536_v48 = vmul.f32 %v531_v45, %v2056_v20  ;;  %v746_v20 = vld [vmem:[%s2341_s6 + $0x30] sm:$0xff] }
 0x2f8   :  { %v537_v50 = vmul.f32 %v535_v47, %v2062_v23  ;;  %v747_v23 = vld [vmem:[%s2341_s6 + $0x38] sm:$0xff] }
 0x2f9   :  { %v546_v52 = vadd.f32 %v541_v49, %v536_v48  ;;  %v1666_v61 = vpack.c.bf16 %v747_v23, %v746_v20  ;;  %v1769_v23 = vld [vmem:[%s2343_s3 + $0x28] sm:$0xff]  }
 0x2fa   :  { %v547_v53 = vadd.f32 %v545_v51, %v537_v50 }
 0x2fb   :  { %vm548_vm4 = vcmp.ge.f32.partialorder %v546_v52, 0.0  ;;  %v550_v54 = vmul.f32 0.2, %v546_v52  ;;  %1667 = vmatpush3.bf16.msra.mxu0 %v1666_v61  ;;  %v1770_v61 = vld [vmem:[%s2343_s3 + $0x30] sm:$0xff]  }
 0x2fc   :  { %v551_v55 = vmul.f32 0.2, %v547_v53  ;;  %vm549_vm5 = vcmp.ge.f32.partialorder %v547_v53, 0.0  ;;  %1668 = vmatprep.subr.bf16.mxu0 %v1787_v30 }
 0x2fd   :  { %v552_v56 = vsel %vm548_vm4, %v546_v52, %v550_v54 }
 0x2fe   :  { %v553_v57 = vsel %vm549_vm5, %v547_v53, %v551_v55  ;;  %v554_v60 = vpack.c.bf16 %v552_v56, %v552_v56 }
 0x2ff   :  { %v555_v59 = vpack.c.bf16 %v553_v57, %v553_v57  ;;  %1670 = vmatpush3.bf16.msra.mxu0 %v1669_v0 }
 0x300   :  { %1671 = vmatprep.subr.bf16.mxu0 %v1787_v30 }
 0x301   :  { %716 = vmatprep.mubr.bf16.mxu1 %v555_v59 }
 0x302   :  { %717 = vmatmul.mubr.bf16.vlgmr.msra.gmra.mrb[4].mxu1 %v554_v60 }
 0x303   :  { %1673 = vmatpush3.bf16.msra.mxu0 %v1672_v3  ;;  %1582 = vmatprep.mubr.msk.bf16.mxu1 %vm1788_vm6, %v1786_v58 }
 0x304   :  { %1674 = vmatprep.subr.bf16.mxu0 %v1787_v30  ;;  %1567 = vmatpush3.bf16.msra.mxu1 %v1764_v36 }
 0x305   :  { %1568 = vmatprep.subr.bf16.mxu1 %v1786_v58 }
 0x307   :  { %1676 = vmatpush3.bf16.msra.mxu0 %v1675_v7 }
 0x308   :  { %1677 = vmatprep.subr.bf16.mxu0 %v1787_v30  ;;  %1569 = vmatpush3.bf16.msra.mxu1 %v1765_v37 }
 0x309   :  { %1570 = vmatprep.subr.bf16.mxu1 %v1786_v58 }
 0x30b   :  { %1679 = vmatpush3.bf16.msra.mxu0 %v1678_v10  ;;  %v1062_v10 = vld [vmem:[%s2344_s7 + $0x8] sm:$0xff] }
 0x30c   :  { %1561 = vmatprep.subr.mxu0 %v1786_v58  ;;  %1571 = vmatpush3.bf16.msra.mxu1 %v1766_v38 }
 0x30d   :  { %1572 = vmatprep.subr.bf16.mxu1 %v1786_v58 }
 0x310   :  { %1573 = vmatpush3.bf16.msra.mxu1 %v1767_v39 }
 0x311   :  { %1574 = vmatprep.subr.bf16.mxu1 %v1786_v58 }
 0x314   :  { %1575 = vmatpush3.bf16.msra.mxu1 %v1768_v40 }
 0x315   :  { %1576 = vmatprep.subr.bf16.mxu1 %v1786_v58 }
 0x318   :  { %1577 = vmatpush3.bf16.msra.mxu1 %v1769_v23 }
 0x319   :  { %1578 = vmatprep.subr.bf16.mxu1 %v1786_v58 }
 0x31c   :  { %1579 = vmatpush3.bf16.msra.mxu1 %v1770_v61 }
 0x31d   :  { %1580 = vmatprep.subr.bf16.mxu1 %v1786_v58 }
 0x320   :  { %1581 = vmatpush3.bf16.msra.mxu1 %v1771_v62 }
 0x321   :  { %1612 = vmatprep.subr.bf16.mxu1 %v1786_v58 }
 0x3d5   :  { %v1475_v11 = vpop.f32.mrb[4].mxu1 }
 0x3d6   :  { %v1476_v12 = vpop.f32.mrb[5].mxu1 }
 0x3d7   :  { %v2208_v13 = vadd.f32 %v1476_v12, %v1475_v11  ;;  %v1478_v14 = vpop.f32.mrb[6].mxu1  ;;  %v1681_v11 = vpack.c.bf16 %v1062_v10, %v1061_v9  ;;  %v1063_v12 = vld [vmem:[%s2344_s7 + $0x10] sm:$0xff] }
 0x3d8   :  { %v1479_v15 = vpop.f32.mrb[7].mxu1 }
 0x3d9   :  { %v724_v16 = vsel %vm290_vm0, %v2208_v13, 0.0  ;;  %v731_v17 = vmul.f32 %v2208_v13, %v2208_v13  ;;  %v1065_v15 = vld [vmem:[%s2344_s7 + $0x20] sm:$0xff] }
 0x3da   :  { %v725_v18 = vrot.slane %v724_v16, 4 }
 0x3db   :  { %v732_v19 = vsel %vm290_vm0, %v731_v17, 0.0 }
 0x3dc   :  { %v726_v21 = vadd.f32 %v725_v18, %v724_v16  ;;  %v733_v22 = vrot.slane %v732_v19, 4  ;;  %v1066_v16 = vld [vmem:[%s2344_s7 + $0x28] sm:$0xff]  ;;  %v1067_v18 = vld [vmem:[%s2344_s7 + $0x30] sm:$0xff] }
 0x3dd   :  { %v1687_v17 = vpack.c.bf16 %v1066_v16, %v1065_v15 }
 0x3de   :  { %v727_v24 = vrot.slane %v726_v21, 2  ;;  %v734_v25 = vadd.f32 %v733_v22, %v732_v19  ;;  %v1068_v19 = vld [vmem:[%s2344_s7 + $0x38] sm:$0xff] }
 0x3e0   :  { %v728_v26 = vadd.f32 %v727_v24, %v726_v21  ;;  %v735_v27 = vrot.slane %v734_v25, 2  ;;  %v1690_v21 = vpack.c.bf16 %v1068_v19, %v1067_v18 }
 0x3e2   :  { %v729_v28 = vrot.slane %v728_v26, 1  ;;  %v736_v29 = vadd.f32 %v735_v27, %v734_v25 }
 0x3e4   :  { %v737_v31 = vrot.slane %v736_v29, 1  ;;  %v730_v32 = vadd.f32 %v729_v28, %v728_v26 }
 0x3e6   :  { %v738_v33 = vadd.f32 %v737_v31, %v736_v29 }
 0x3e8   :  { %v739_v34 = vsel %vm321_vm1, %v730_v32, %v738_v33 }
 0x3e9   :  { %1559 = vmatmul.mubr.f32.vlgmr.msra.gmra.mrb[4].mxu0 %v739_v34 }
 0x3ea   :  { %1563 = vmatprep.mubr.msk.f32.mxu0 %vm1788_vm6, %v1786_v58  ;;  %1562 = vmatpush3.msra.mxu0 %v851_v35 }
 0x3eb   :  { %1680 = vmatprep.subr.bf16.mxu0 %v1787_v30 }
 0x4bc   :  { %v822_v44 = vpop.f32.mrb[4].mxu0 }
 0x4bd   :  { %v826_v45 = vmul.f32 0.03125, %v822_v44  ;;  %v1560_v46 = vpop.f32.mrb[5].mxu0 }
 0x4be   :  { %v1168_v46 = vld [vmem:[%s2345_s10] sm:$0xff] }
 0x4bf   :  { %v827_v47 = vmul.f32 %v826_v45, %v826_v45 }
 0x4c1   :  { %v829_v48 = vrot.slane %v827_v47, 7  ;;  %v1169_v47 = vld [vmem:[%s2345_s10 + $0x8] sm:$0xff] }
 0x4c3   :  { %v831_v49 = vsub.f32 %v826_v45, %v829_v48  ;;  %v1693_v48 = vpack.c.bf16 %v1169_v47, %v1168_v46 }
 0x4c5   :  { %v832_v50 = vmax.f32 %v831_v49, 0.0  ;;  %v1772_v49 = vld [vmem:[%s2346_s4] sm:$0xff]  }
 0x4c7   :  { %v833_v51 = vadd.f32 1e-05, %v832_v50 }
 0x4c9   :  { %1778 = vrsqrt.f32 %v833_v51 }
 0x4d3   :  { %v1779_v52 = vpop.eup %1778 }
 0x4d4   :  { %v836_v53 = vrot.slane %v1779_v52, 7 }
 0x4d6   :  { %v838_v54 = vmul.f32 %v836_v53, %v2082_v6 }
 0x4d8   :  { %v840_v55 = vrot.slane %v838_v54, 2 }
 0x4da   :  { %v842_v56 = vmul.f32 %v840_v55, %v826_v45 }
 0x4dc   :  { %v844_v57 = vrot.slane %v842_v56, 5 }
 0x4de   :  { %v846_v59 = vsub.f32 %v2082_v6, %v844_v57 }
 0x4e0   :  { %v848_v60 = vrot.slane %v846_v59, 2 }
 0x4e2   :  { %v850_v20 = vsel %vm321_vm1, %v840_v55, %v848_v60 }
 0x4e3   :  { %1564 = vmatmul.mubr.msk.f32.vlgmr.msra.gmra.mrb[6].mxu0 %vm852_vm7, %v850_v20 }
 0x4e4   :  { %1602 = vmatprep.mubr.msk.f32.mxu0 %vm1788_vm6, %v1786_v58  ;;  %1682 = vmatpush3.bf16.msra.mxu0 %v1681_v11 }
 0x4e5   :  { %1683 = vmatprep.subr.bf16.mxu0 %v1787_v30 }
 0x5b6   :  { %v922_v63 = vpop.f32.mrb[6].mxu0 }
 0x5b7   :  { %v929_v0 = vrot.slane %v922_v63, %v2158_v42  ;;  %v1565_v1 = vpop.f32.mrb[7].mxu0  ;;  %v934_v3 = vrot.slane %v922_v63, %v2161_v43 }
 0x5b9   :  { %v930_v2 = vmul.f32 %v2208_v13, %v929_v0  ;;  %v1064_v13 = vld [vmem:[%s2344_s7 + $0x18] sm:$0xff] }
 0x5ba   :  { %v1684_v14 = vpack.c.bf16 %v1064_v13, %v1063_v12 }
 0x5bb   :  { %v935_v4 = vadd.f32 %v934_v3, %v930_v2  ;;  %v1773_v2 = vld [vmem:[%s2346_s4 + $0x8] sm:$0xff]   ;;  %v1774_v3 = vld [vmem:[%s2346_s4 + $0x10] sm:$0xff]  }
 0x5bc   :  { %1685 = vmatpush3.bf16.msra.mxu0 %v1684_v14 }
 0x5bd   :  { %vm936_vm8 = vcmp.ge.f32.partialorder %v935_v4, 0.0  ;;  %v937_v5 = vmul.f32 0.2, %v935_v4  ;;  %1686 = vmatprep.subr.bf16.mxu0 %v1787_v30 }
 0x5bf   :  { %v938_v7 = vsel %vm936_vm8, %v935_v4, %v937_v5  ;;  %v1775_v4 = vld [vmem:[%s2346_s4 + $0x18] sm:$0xff]   ;;  %s1789_s4 = smov 64  }
 0x5c0   :  { %v939_v8 = vpack.c.bf16 %v938_v7, %v938_v7  ;;  %1688 = vmatpush3.bf16.msra.mxu0 %v1687_v17 }
 0x5c1   :  { %1689 = vmatprep.subr.bf16.mxu0 %v1787_v30 }
 0x5c2   :  { %1583 = vmatmul.mubr.bf16.vlgmr.msra.gmra.mrb[8].mxu1 %v939_v8 }
 0x5c3   :  { %1620 = vmatprep.mubr.msk.bf16.mxu1 %vm1788_vm6, %v1786_v58  ;;  %1613 = vmatpush3.bf16.msra.mxu1 %v1772_v49 }
 0x5c4   :  { %1691 = vmatpush3.bf16.msra.mxu0 %v1690_v21  ;;  %1614 = vmatprep.subr.bf16.mxu1 %v1786_v58 }
 0x5c5   :  { %1692 = vmatprep.subr.bf16.mxu0 %v1787_v30 }
 0x5c7   :  { %1615 = vmatpush3.bf16.msra.mxu1 %v1773_v2 }
 0x5c8   :  { %1616 = vmatprep.subr.bf16.mxu1 %v1786_v58 }
 0x5cb   :  { %1617 = vmatpush3.bf16.msra.mxu1 %v1774_v3 }
 0x5cc   :  { %1618 = vmatprep.subr.bf16.mxu1 %v1786_v58 }
 0x5cf   :  { %1619 = vmatpush3.bf16.msra.mxu1 %v1775_v4 }
 0x695   :  { %v2292_v22 = vpop.f32.mrb[8].mxu1 }
 0x696   :  { %v1045_v24 = vsel %vm1044_vm9, %v2292_v22, 0.0  ;;  %v1052_v25 = vmul.f32 %v2292_v22, %v2292_v22  ;;  %v1584_v26 = vpop.f32.mrb[9].mxu1 }
 0x697   :  { %v1046_v27 = vrot.slane %v1045_v24, 4  ;;  %v1041_v28 = vpop.f32.mrb[10].mxu1 }
 0x698   :  { %v1053_v29 = vsel %vm1044_vm9, %v1052_v25, 0.0  ;;  %v1585_v31 = vpop.f32.mrb[11].mxu1 }
 0x699   :  { %v1047_v32 = vadd.f32 %v1046_v27, %v1045_v24  ;;  %v1054_v33 = vrot.slane %v1053_v29, 4 }
 0x69b   :  { %v1048_v34 = vrot.slane %v1047_v32, 2  ;;  %v1055_v35 = vadd.f32 %v1054_v33, %v1053_v29 }
 0x69d   :  { %v1049_v36 = vadd.f32 %v1048_v34, %v1047_v32  ;;  %v1056_v37 = vrot.slane %v1055_v35, 2 }
 0x69f   :  { %v1050_v30 = vrot.slane %v1049_v36, 1  ;;  %v1057_v38 = vadd.f32 %v1056_v37, %v1055_v35 }
 0x6a1   :  { %v1058_v39 = vrot.slane %v1057_v38, 1  ;;  %v1051_v40 = vadd.f32 %v1050_v30, %v1049_v36 }
 0x6a3   :  { %v1059_v44 = vadd.f32 %v1058_v39, %v1057_v38 }
 0x6a5   :  { %v1060_v45 = vsel %vm321_vm1, %v1051_v40, %v1059_v44 }
 0x6a6   :  { %1603 = vmatmul.mubr.msk.f32.vlgmr.msra.gmra.mrb[8].mxu0 %vm1069_vm10, %v1060_v45 }
 0x6a7   :  { %1609 = vmatprep.mubr.msk.f32.mxu0 %vm1788_vm6, %v1786_v58  ;;  %1694 = vmatpush3.bf16.msra.mxu0 %v1693_v48  ;;  %v1268_v58 = vsub.s32 6, %v2155_v41 }
 0x6a9   :  { %v1269_v15 = vrot.slane %v2082_v6, %v1268_v58 }
 0x779   :  { %v1139_v50 = vpop.f32.mrb[8].mxu0 }
 0x77a   :  { %v1143_v51 = vmul.f32 0.125, %v1139_v50  ;;  %v1604_v52 = vpop.f32.mrb[9].mxu0 }
 0x77c   :  { %v1144_v53 = vmul.f32 %v1143_v51, %v1143_v51 }
 0x77e   :  { %v1146_v54 = vrot.slane %v1144_v53, 7 }
 0x780   :  { %v1148_v55 = vsub.f32 %v1143_v51, %v1146_v54 }
 0x782   :  { %v1149_v56 = vmax.f32 %v1148_v55, 0.0 }
 0x784   :  { %v1150_v57 = vadd.f32 1e-05, %v1149_v56 }
 0x786   :  { %1780 = vrsqrt.f32 %v1150_v57 }
 0x790   :  { %v1781_v59 = vpop.eup %1780 }
 0x791   :  { %v1153_v60 = vrot.slane %v1781_v59, 5 }
 0x793   :  { %v1155_v20 = vmul.f32 %v1153_v60, %v2082_v6 }
 0x795   :  { %v1157_v23 = vrot.slane %v1155_v20, 4 }
 0x797   :  { %v1159_v61 = vmul.f32 %v1157_v23, %v1143_v51 }
 0x799   :  { %v1161_v62 = vrot.slane %v1159_v61, 3 }
 0x79b   :  { %v1163_v63 = vsub.f32 %v2082_v6, %v1161_v62 }
 0x79d   :  { %v1165_v0 = vrot.slane %v1163_v63, 4 }
 0x79f   :  { %v1167_v1 = vsel %vm321_vm1, %v1157_v23, %v1165_v0 }
 0x7a0   :  { %1610 = vmatmul.mubr.msk.f32.vlgmr.msra.gmra.mrb[10].mxu0 %vm1170_vm11, %v1167_v1 }
 0x873   :  { %v1240_v5 = vpop.f32.mrb[10].mxu0 }
 0x874   :  { %v1247_v7 = vrot.slane %v1240_v5, %v2158_v42  ;;  %v1611_v8 = vpop.f32.mrb[11].mxu0  ;;  %v1252_v10 = vrot.slane %v1240_v5, %v2161_v43 }
 0x876   :  { %v1248_v9 = vmul.f32 %v1247_v7, %v2292_v22 }
 0x878   :  { %v1253_v11 = vadd.f32 %v1252_v10, %v1248_v9 }
 0x87a   :  { %vm1254_vm12 = vcmp.ge.f32.partialorder %v1253_v11, 0.0  ;;  %v1255_v12 = vmul.f32 0.2, %v1253_v11 }
 0x87c   :  { %v1256_v13 = vsel %vm1254_vm12, %v1253_v11, %v1255_v12 }
 0x87d   :  { %v1257_v14 = vpack.c.bf16 %v1256_v13, %v1256_v13 }
 0x87f   :  { %1621 = vmatmul.mubr.msk.bf16.vlgmr.msra.gmra.mrb[12].mxu1 %vm1069_vm10, %v1257_v14 }
 0x952   :  { %v1331_v16 = vpop.f32.mrb[12].mxu1 }
 0x953   :  { %v1332_v17 = vadd.f32 %v1331_v16, %v1269_v15  ;;  %v1622_v18 = vpop.f32.mrb[13].mxu1 }
 0x954   :  { %v1334_v42 = vpop.f32.mrb[14].mxu1 }
 0x955   :  { %v1423_v19 = vmul.f32 -1.442695, %v1332_v17  ;;  %v1623_v21 = vpop.f32.mrb[15].mxu1 }
 0x957   :  { %1782 = vpow2.f32 %v1423_v19 }
 0x961   :  { %v1783_v22 = vpop.eup %1782 }
 0x962   :  { %v1340_v43 = vadd.f32 1.0, %v1783_v22 }
 0x964   :  { %1784 = vrcp.f32 %v1340_v43 }
 0x96e   :  { %v1785_v24 = vpop.eup %1784 }
 0x96f   :  { %1344 = vrot.lane.b32.xlu0 %v1785_v24, %s1789_s4 }
 0x9e1   :  { %v1345_v25 = vpop.permute.xlu0 %1344 }
 0x9e2   :  { %v1347_v26 = vsel %vm1069_vm10, %v1256_v13, %v1345_v25 }
 0x9e3   :  { %v1349_v41 = vsel %vm1348_vm13, %v1347_v26, 0.0 }
 0x9e4   :  { %1350 = vst [vmem:[%s2347_s12] sm:$0x3] %v1349_v41 }

</bundles_post_ra>
